<compile_context>
chip_gen: v6e
topology: v6e:2x2x1
jax: 0.10.0
libtpu: 0.0.40
codegen_flags: <defaults>
</compile_context>

<pallas_src>
import jax
import jax.numpy as jnp
from jax.experimental import pallas as pl
from jax.experimental.pallas import tpu as pltpu


def _round_up(n, m):
    return (n + m - 1) // m * m


def mlp_kernel(x_ref, w1_ref, b1_ref, w2_ref, b2_ref, out_ref):
    # x_ref:   (tb, obs)        streamed over the batch grid
    # w1_ref:  (obs, hidden)    VMEM-resident
    # b1_ref:  (1, hidden)      VMEM-resident
    # w2_ref:  (hidden, action) VMEM-resident
    # b2_ref:  (1, action)      VMEM-resident
    # out_ref: (tb, action)     minimal writeback (action == full array dim)
    x = x_ref[...]

    # Layer 1 on the MXU (the matmul slot is otherwise idle); bias + ReLU on the VPU.
    h = jnp.dot(x, w1_ref[...],
                preferred_element_type=jnp.float32,
                precision=jax.lax.Precision.HIGHEST)
    h = jnp.maximum(h + b1_ref[...], 0.0)

    # Layer 2 on the MXU: emits the (tb, action) output rows directly (no iota/where
    # scatter, no padded output slab).
    y = jnp.dot(h, w2_ref[...],
                preferred_element_type=jnp.float32,
                precision=jax.lax.Precision.HIGHEST)
    out_ref[...] = (y + b2_ref[...]).astype(out_ref.dtype)


def net_forward(x, w1, b1, w2, b2, *, block_b=1024):
    """y = relu(x @ w1 + b1) @ w2 + b2 via a single pallas_call.

    x: (B, obs); w1: (obs, hidden); b1: (hidden,); w2: (hidden, action); b2: (action,)
    """
    B, obs = x.shape
    hidden = w1.shape[1]
    action = w2.shape[1]

    # Batch tile: multiple of 8 (sublane), no padding of x in HBM — the tail block is
    # clipped by Pallas.  For mid/large B force >= 2 grid steps so the "parallel" batch
    # axis can shard across both TensorCores on v7x.
    n_steps = pl.cdiv(B, block_b)
    if n_steps < 2 and B >= 512:
        n_steps = 2
    tb = min(_round_up(pl.cdiv(B, n_steps), 8), _round_up(B, 8))
    grid = (pl.cdiv(B, tb),)

    out = pl.pallas_call(
        mlp_kernel,
        out_shape=jax.ShapeDtypeStruct((B, action), x.dtype),
        grid=grid,
        in_specs=[
            pl.BlockSpec((tb, obs), lambda i: (i, 0)),          # x: streams over batch
            pl.BlockSpec((obs, hidden), lambda i: (0, 0)),      # W1: VMEM-resident
            pl.BlockSpec((1, hidden), lambda i: (0, 0)),        # b1: VMEM-resident
            pl.BlockSpec((hidden, action), lambda i: (0, 0)),   # W2: VMEM-resident
            pl.BlockSpec((1, action), lambda i: (0, 0)),        # b2: VMEM-resident
        ],
        out_specs=pl.BlockSpec((tb, action), lambda i: (i, 0)),  # tiny (8 B/row) writeback
        compiler_params=pltpu.CompilerParams(
            dimension_semantics=("parallel",),
        ),
    )(x, w1, b1.reshape(1, hidden), w2, b2.reshape(1, action))
    return out


def init_params(key, observation_size, hidden_size, action_size):
    """Deterministic init mimicking torch.nn.Linear (uniform +/- 1/sqrt(fan_in)).

    Returns W1 (obs, hidden) == torch.weight1.T, W2 (hidden, action) == torch.weight2.T.
    """
    k1, k2, k3, k4 = jax.random.split(key, 4)
    bound1 = 1.0 / jnp.sqrt(observation_size)
    bound2 = 1.0 / jnp.sqrt(hidden_size)
    w1 = jax.random.uniform(k1, (observation_size, hidden_size), jnp.float32, -bound1, bound1)
    b1 = jax.random.uniform(k2, (hidden_size,), jnp.float32, -bound1, bound1)
    w2 = jax.random.uniform(k3, (hidden_size, action_size), jnp.float32, -bound2, bound2)
    b2 = jax.random.uniform(k4, (action_size,), jnp.float32, -bound2, bound2)
    return w1, b1, w2, b2


def _reference(x, w1, b1, w2, b2):
    return jnp.maximum(x @ w1 + b1, 0.0) @ w2 + b2


if __name__ == "__main__":
    # CartPole-like sizes: observation=4, hidden=32, actions=2
    observation_size, hidden_size, action_size = 4, 32, 2

    key = jax.random.PRNGKey(0)
    kx, kp, kx2 = jax.random.split(key, 3)
    w1, b1, w2, b2 = init_params(kp, observation_size, hidden_size, action_size)

    # Small-batch check (single grid step)
    x = jax.random.normal(kx, (8, observation_size), jnp.float32)
    out = jax.block_until_ready(net_forward(x, w1, b1, w2, b2))
    ref = _reference(x, w1, b1, w2, b2)
    assert out.shape == (8, action_size)
    assert jnp.allclose(out, ref, atol=1e-3, rtol=1e-3), float(jnp.max(jnp.abs(out - ref)))

    # Larger batch: multiple grid steps + clipped (non-divisible) tail block, resident weights
    x_big = jax.random.normal(kx2, (600, observation_size), jnp.float32)
    out_big = jax.block_until_ready(net_forward(x_big, w1, b1, w2, b2))
    ref_big = _reference(x_big, w1, b1, w2, b2)
    assert out_big.shape == (600, action_size)
    assert jnp.allclose(out_big, ref_big, atol=1e-3, rtol=1e-3), float(jnp.max(jnp.abs(out_big - ref_big)))

    print("KERNEL_OK")
</pallas_src>

<mosaic_0001>
module attributes {stable_mosaic.version = 11 : i64} {
  func.func @mlp_kernel(%arg0: i32, %arg1: memref<8x4xf32, #tpu.memory_space<vmem>>, %arg2: memref<4x32xf32, #tpu.memory_space<vmem>>, %arg3: memref<1x32xf32, #tpu.memory_space<vmem>>, %arg4: memref<32x2xf32, #tpu.memory_space<vmem>>, %arg5: memref<1x2xf32, #tpu.memory_space<vmem>>, %arg6: memref<8x2xf32, #tpu.memory_space<vmem>>) attributes {dimension_semantics = [#tpu.dimension_semantics<parallel>], iteration_bounds = array<i64: 1>, scalar_prefetch = 0 : i64, scratch_operands = 0 : i64, tpu.core_type = #tpu.core_type<tc>, window_params = [{transform_indices = @transform_0, window_bounds = array<i64: 8, 4>}, {pipeline_mode = #tpu.pipeline_mode<synchronous>, transform_indices = @transform_1, window_bounds = array<i64: 4, 32>}, {pipeline_mode = #tpu.pipeline_mode<synchronous>, transform_indices = @transform_2, window_bounds = array<i64: 1, 32>}, {pipeline_mode = #tpu.pipeline_mode<synchronous>, transform_indices = @transform_3, window_bounds = array<i64: 32, 2>}, {pipeline_mode = #tpu.pipeline_mode<synchronous>, transform_indices = @transform_4, window_bounds = array<i64: 1, 2>}, {transform_indices = @transform_5, window_bounds = array<i64: 8, 2>}]} {
    %c0 = arith.constant 0 : index
    %c0_0 = arith.constant 0 : index
    %0 = vector.load %arg1[%c0, %c0_0] : memref<8x4xf32, #tpu.memory_space<vmem>>, vector<8x4xf32>
    %c0_1 = arith.constant 0 : index
    %c0_2 = arith.constant 0 : index
    %1 = vector.load %arg2[%c0_1, %c0_2] : memref<4x32xf32, #tpu.memory_space<vmem>>, vector<4x32xf32>
    %cst = arith.constant dense<0.000000e+00> : vector<8x32xf32>
    %2 = tpu.matmul %0, %1, %cst {dimension_numbers = #tpu.dot_dimension_numbers<[1], [0], [0], [1], [0, 0, 1, 1], [], []>, precision = #tpu.contract_precision<fp32>} : vector<8x4xf32>, vector<4x32xf32>, vector<8x32xf32> -> vector<8x32xf32>
    %c0_3 = arith.constant 0 : index
    %c0_4 = arith.constant 0 : index
    %3 = vector.load %arg3[%c0_3, %c0_4] : memref<1x32xf32, #tpu.memory_space<vmem>>, vector<1x32xf32>
    %4 = vector.broadcast %3 : vector<1x32xf32> to vector<8x32xf32>
    %5 = arith.addf %2, %4 : vector<8x32xf32>
    %cst_5 = arith.constant 0.000000e+00 : f32
    %6 = vector.broadcast %cst_5 : f32 to vector<8x32xf32>
    %7 = arith.maximumf %5, %6 : vector<8x32xf32>
    %c0_6 = arith.constant 0 : index
    %c0_7 = arith.constant 0 : index
    %8 = vector.load %arg4[%c0_6, %c0_7] : memref<32x2xf32, #tpu.memory_space<vmem>>, vector<32x2xf32>
    %cst_8 = arith.constant dense<0.000000e+00> : vector<8x2xf32>
    %9 = tpu.matmul %7, %8, %cst_8 {dimension_numbers = #tpu.dot_dimension_numbers<[1], [0], [0], [1], [0, 0, 1, 1], [], []>, precision = #tpu.contract_precision<fp32>} : vector<8x32xf32>, vector<32x2xf32>, vector<8x2xf32> -> vector<8x2xf32>
    %c0_9 = arith.constant 0 : index
    %c0_10 = arith.constant 0 : index
    %10 = vector.load %arg5[%c0_9, %c0_10] : memref<1x2xf32, #tpu.memory_space<vmem>>, vector<1x2xf32>
    %11 = vector.broadcast %10 : vector<1x2xf32> to vector<8x2xf32>
    %12 = arith.addf %9, %11 : vector<8x2xf32>
    %c0_11 = arith.constant 0 : index
    %c0_12 = arith.constant 0 : index
    %13 = vector.load %arg6[%c0_11, %c0_12] : memref<8x2xf32, #tpu.memory_space<vmem>>, vector<8x2xf32>
    tpu.vector_store %arg6[%c0_11, %c0_12], %12 {strides = array<i32>} : memref<8x2xf32, #tpu.memory_space<vmem>>, vector<8x2xf32>,
    return
  }
  func.func @transform_0(%arg0: i32) -> (i32, i32) {
    %c0_i32 = arith.constant 0 : i32
    %c0_i32_0 = arith.constant 0 : i32
    return %arg0, %c0_i32 : i32, i32
  }
  func.func @transform_1(%arg0: i32) -> (i32, i32) {
    %c0_i32 = arith.constant 0 : i32
    %c0_i32_0 = arith.constant 0 : i32
    %c0_i32_1 = arith.constant 0 : i32
    return %c0_i32, %c0_i32_0 : i32, i32
  }
  func.func @transform_2(%arg0: i32) -> (i32, i32) {
    %c0_i32 = arith.constant 0 : i32
    %c0_i32_0 = arith.constant 0 : i32
    %c0_i32_1 = arith.constant 0 : i32
    return %c0_i32, %c0_i32_0 : i32, i32
  }
  func.func @transform_3(%arg0: i32) -> (i32, i32) {
    %c0_i32 = arith.constant 0 : i32
    %c0_i32_0 = arith.constant 0 : i32
    %c0_i32_1 = arith.constant 0 : i32
    return %c0_i32, %c0_i32_0 : i32, i32
  }
  func.func @transform_4(%arg0: i32) -> (i32, i32) {
    %c0_i32 = arith.constant 0 : i32
    %c0_i32_0 = arith.constant 0 : i32
    %c0_i32_1 = arith.constant 0 : i32
    return %c0_i32, %c0_i32_0 : i32, i32
  }
  func.func @transform_5(%arg0: i32) -> (i32, i32) {
    %c0_i32 = arith.constant 0 : i32
    %c0_i32_0 = arith.constant 0 : i32
    return %arg0, %c0_i32 : i32, i32
  }
}

</mosaic_0001>

<bundles_post_ra>
// kernel: tpu_custom_call.1
= control target key start
LH: loop header
LB: loop body
LE: loop exit
PB: predicated region body
PF: predicated region fallthrough
CT: control target
= control target key end

     0   :  { %vm33_vm0 = vcmask 1043456   ;;  %vm29_vm1 = vcmask 31744   ;;  %v1132_v0 = vmov 0.0   ;;  %vm1133_vm2 = vmmov 0   ;;  %s1305_s1 = inlined_call_operand.vmem [shape: f32[4,32], index: 1, kind: input, shape index: {}]   ;;  %s1306_s0 = inlined_call_operand.vmem [shape: f32[8,4], index: 0, kind: input, shape index: {}]   ;;  %s1307_s3 = inlined_call_operand.vmem [shape: f32[32,2], index: 3, kind: input, shape index: {}]   ;;  %s1308_s2 = inlined_call_operand.vmem [shape: f32[1,32], index: 2, kind: input, shape index: {}]   ;;  %s1309_s4 = inlined_call_operand.vmem [shape: f32[1,2], index: 4, kind: input, shape index: {}]   ;;  %s1310_s5 = inlined_call_operand.vmem [shape: f32[8,2], index: 5, kind: output, shape index: {}]  }
   0x1   :  { %1034 = vmatprep.subr.mxu0 %v1132_v0  ;;  %v21_v1 = vld [vmem:[%s1305_s1] sm:$0xf]  ;;  %1036 = vmatprep.mubr.msk.f32.mxu0 %vm1133_vm2, %v1132_v0  ;;  %v487_v15 = vld [vmem:[%s1307_s3 + $0x18] sm:$0xff]  ;;  %v486_v17 = vld [vmem:[%s1307_s3 + $0x10] sm:$0xff]  ;;  %vm495_vm3 = vcmask 261120   ;;  %vm984_vm4 = vcmask 15360  }
   0x2   :  { %v20_v2 = vld [vmem:[%s1306_s0] sm:$0xff]  ;;  %v35_v3 = vsel %vm33_vm0, %v21_v1, 0  ;;  %1039 = vmatprep.subr.mxu1 %v1132_v0  ;;  %1041 = vmatprep.mubr.msk.f32.mxu1 %vm1133_vm2, %v1132_v0  ;;  %v1197_v16 = vand.u32 4294901760, %v487_v15  ;;  %v1205_v19 = vand.u32 4294901760, %v486_v17  ;;  %v485_v20 = vld [vmem:[%s1307_s3 + $0x8] sm:$0xff] }
   0x3   :  { %v31_v4 = vsel %vm29_vm1, %v20_v2, 0  ;;  %v68_v5 = vand.u32 4294901760, %v35_v3  ;;  %v1216_v23 = vand.u32 4294901760, %v485_v20  ;;  %v484_v24 = vld [vmem:[%s1307_s3] sm:$0xff] }
   0x4   :  { %v103_v6 = vand.u32 4294901760, %v31_v4  ;;  %v1203_v18 = vsub.f32 %v487_v15, %v1197_v16  ;;  %v1214_v22 = vsub.f32 %v486_v17, %v1205_v19  ;;  %v1230_v28 = vand.u32 4294901760, %v484_v24  ;;  %v990_v39 = vld [vmem:[%s1308_s2] ss:$0 sm:$0xff] }
   0x5   :  { %1035 = vmatpush3.msra.mxu0 %v68_v5  ;;  %v145_v8 = vsub.f32 %v35_v3, %v68_v5  ;;  %v1228_v27 = vsub.f32 %v485_v20, %v1216_v23 }
   0x6   :  { %v104_v7 = vsub.f32 %v31_v4, %v103_v6  ;;  %1044 = vmatprep.subr.mxu0 %v1132_v0  ;;  %v605_v21 = vand.u32 4294901760, %v1203_v18  ;;  %v612_v26 = vand.u32 4294901760, %v1214_v22  ;;  %v1239_v32 = vsub.f32 %v484_v24, %v1230_v28 }
   0x7   :  { %v146_v10 = vand.u32 4294901760, %v145_v8  ;;  %v619_v31 = vand.u32 4294901760, %v1228_v27 }
   0x8   :  { %v105_v9 = vand.u32 4294901760, %v104_v7  ;;  %v606_v25 = vsub.f32 %v1203_v18, %v605_v21  ;;  %v613_v30 = vsub.f32 %v1214_v22, %v612_v26  ;;  %v626_v35 = vand.u32 4294901760, %v1239_v32 }
   0x9   :  { %v147_v12 = vsub.f32 %v145_v8, %v146_v10  ;;  %v620_v34 = vsub.f32 %v1228_v27, %v619_v31 }
   0xa   :  { %v106_v11 = vsub.f32 %v104_v7, %v105_v9  ;;  %v607_v29 = vand.u32 4294901760, %v606_v25  ;;  %v614_v33 = vand.u32 4294901760, %v613_v30  ;;  %v627_v37 = vsub.f32 %v1239_v32, %v626_v35 }
   0xb   :  { %v148_v14 = vand.u32 4294901760, %v147_v12  ;;  %v621_v36 = vand.u32 4294901760, %v620_v34 }
   0xc   :  { %v107_v13 = vand.u32 4294901760, %v106_v11  ;;  %v628_v38 = vand.u32 4294901760, %v627_v37 }
   0xd   :  { %1040 = vmatpush3.msra.mxu1 %v148_v14 }
   0xe   :  { %1037 = vmatmul.mubr.f32.vlgmr.msra.gmra.mxu0 %v107_v13  ;;  %1042 = vmatmul.mubr.f32.vlgmr.msra.gmra.mxu1 %v103_v6 }
   0xf   :  { %1045 = vmatpush3.msra.mxu0 %v145_v8  ;;  %1049 = vmatprep.subr.mxu1 %v1132_v0  ;;  %v991_v8 = vld [vmem:[%s1309_s4] ss:$0 sm:$0xff] }
  0x10   :  { %1046 = vmatprep.mubr.msk.f32.mxu0 %vm1133_vm2, %v1132_v0  ;;  %1050 = vmatpush3.msra.mxu1 %v68_v5 }
  0x11   :  { %1054 = vmatprep.subr.mxu0 %v1132_v0  ;;  %1051 = vmatprep.mubr.msk.f32.mxu1 %vm1133_vm2, %v1132_v0 }
  0x12   :  { %1047 = vmatmul.mubr.f32.vlgmr.msra.gmra.mxu0 %v104_v7  ;;  %1052 = vmatmul.mubr.f32.vlgmr.msra.gmra.mxu1 %v105_v9 }
  0x13   :  { %1055 = vmatpush3.msra.mxu0 %v146_v10  ;;  %1059 = vmatprep.subr.mxu1 %v1132_v0 }
  0x14   :  { %1056 = vmatprep.mubr.msk.f32.mxu0 %vm1133_vm2, %v1132_v0  ;;  %1060 = vmatpush3.msra.mxu1 %v68_v5 }
  0x15   :  { %1061 = vmatprep.mubr.msk.f32.mxu1 %vm1133_vm2, %v1132_v0  ;;  %1075 = vmatprep.subr.mxu1 %v1132_v0 }
  0x16   :  { %1057 = vmatmul.mubr.f32.vlgmr.msra.gmra.mxu0 %v103_v6  ;;  %1062 = vmatmul.mubr.f32.vlgmr.msra.gmra.mxu1 %v103_v6 }
  0x17   :  { %1064 = vmatprep.subr.mxu0 %v1132_v0  ;;  %1083 = vmatprep.mubr.msk.f32.mxu1 %vm1133_vm2, %v1132_v0 }
  0x18   :  { %1072 = vmatprep.mubr.msk.f32.mxu0 %vm1133_vm2, %v1132_v0  ;;  %1065 = vmatpush3.msra.mxu0 %v1197_v16 }
  0x19   :  { %1066 = vmatprep.subr.mxu0 %v1132_v0  ;;  %1076 = vmatpush3.msra.mxu1 %v607_v29 }
  0x1a   :  { %1067 = vmatpush3.msra.mxu0 %v1205_v19  ;;  %1077 = vmatprep.subr.mxu1 %v1132_v0 }
  0x1b   :  { %1068 = vmatprep.subr.mxu0 %v1132_v0  ;;  %1078 = vmatpush3.msra.mxu1 %v614_v33 }
  0x1c   :  { %1069 = vmatpush3.msra.mxu0 %v1216_v23  ;;  %1079 = vmatprep.subr.mxu1 %v1132_v0 }
  0x1d   :  { %1070 = vmatprep.subr.mxu0 %v1132_v0  ;;  %1080 = vmatpush3.msra.mxu1 %v621_v36 }
  0x1e   :  { %1071 = vmatpush3.msra.mxu0 %v1230_v28  ;;  %1081 = vmatprep.subr.mxu1 %v1132_v0 }
  0x1f   :  { %1086 = vmatprep.subr.mxu0 %v1132_v0  ;;  %1082 = vmatpush3.msra.mxu1 %v628_v38 }
  0x20   :  { %1097 = vmatprep.subr.mxu1 %v1132_v0 }
  0xce   :  { %v109_v40 = vpop.f32.mrf.mxu0  ;;  %v185_v42 = vpop.f32.mrf.mxu1 }
  0xcf   :  { %v110_v41 = vadd.f32 %v990_v39, %v109_v40 }
  0xd0   :  { %v1038_v43 = vpop.f32.mrf.mxu0  ;;  %v1043_v45 = vpop.f32.mrf.mxu1 }
  0xd1   :  { %v186_v44 = vadd.f32 %v185_v42, %v110_v41 }
  0xd2   :  { %v259_v46 = vpop.f32.mrf.mxu0  ;;  %v333_v48 = vpop.f32.mrf.mxu1 }
  0xd3   :  { %v260_v47 = vadd.f32 %v259_v46, %v186_v44 }
  0xd4   :  { %v1048_v49 = vpop.f32.mrf.mxu0  ;;  %v1053_v51 = vpop.f32.mrf.mxu1 }
  0xd5   :  { %v334_v50 = vadd.f32 %v333_v48, %v260_v47 }
  0xd6   :  { %v407_v52 = vpop.f32.mrf.mxu0  ;;  %v479_v54 = vpop.f32.mrf.mxu1 }
  0xd7   :  { %v408_v53 = vadd.f32 %v407_v52, %v334_v50 }
  0xd8   :  { %v1058_v55 = vpop.f32.mrf.mxu0  ;;  %v1063_v57 = vpop.f32.mrf.mxu1 }
  0xd9   :  { %v480_v56 = vadd.f32 %v479_v54, %v408_v53 }
  0xdb   :  { %v483_v58 = vmax.f32 %v480_v56, 0.0 }
  0xdd   :  { %v497_v59 = vsel %vm495_vm3, %v483_v58, 0 }
  0xde   :  { %v568_v60 = vand.u32 4294901760, %v497_v59 }
  0xe0   :  { %v569_v61 = vsub.f32 %v497_v59, %v568_v60  ;;  %1084 = vmatmul.mubr.f32.vlgmr.msra.gmra.mxu1 %v568_v60 }
  0xe1   :  { %1098 = vmatpush3.msra.mxu1 %v1197_v16  ;;  %1105 = vmatprep.mubr.msk.f32.mxu1 %vm1133_vm2, %v1132_v0 }
  0xe2   :  { %1099 = vmatprep.subr.mxu1 %v1132_v0  ;;  %v570_v62 = vand.u32 4294901760, %v569_v61 }
  0xe3   :  { %1100 = vmatpush3.msra.mxu1 %v1205_v19 }
  0xe4   :  { %1101 = vmatprep.subr.mxu1 %v1132_v0  ;;  %v571_v63 = vsub.f32 %v569_v61, %v570_v62 }
  0xe5   :  { %1102 = vmatpush3.msra.mxu1 %v1216_v23 }
  0xe6   :  { %1103 = vmatprep.subr.mxu1 %v1132_v0  ;;  %v572_v1 = vand.u32 4294901760, %v571_v63 }
  0xe7   :  { %1104 = vmatpush3.msra.mxu1 %v1230_v28 }
  0xe8   :  { %1106 = vmatmul.mubr.f32.vlgmr.msra.gmra.mxu1 %v570_v62  ;;  %1119 = vmatprep.subr.mxu1 %v1132_v0 }
  0xe9   :  { %1073 = vmatmul.mubr.f32.vlgmr.msra.gmra.mxu0 %v572_v1  ;;  %1120 = vmatpush3.msra.mxu1 %v1197_v16 }
  0xea   :  { %1087 = vmatpush3.msra.mxu0 %v1203_v18  ;;  %1121 = vmatprep.subr.mxu1 %v1132_v0 }
  0xeb   :  { %1088 = vmatprep.subr.mxu0 %v1132_v0  ;;  %1122 = vmatpush3.msra.mxu1 %v1205_v19 }
  0xec   :  { %1089 = vmatpush3.msra.mxu0 %v1214_v22  ;;  %1123 = vmatprep.subr.mxu1 %v1132_v0 }
  0xed   :  { %1090 = vmatprep.subr.mxu0 %v1132_v0  ;;  %1124 = vmatpush3.msra.mxu1 %v1216_v23 }
  0xee   :  { %1091 = vmatpush3.msra.mxu0 %v1228_v27  ;;  %1125 = vmatprep.subr.mxu1 %v1132_v0 }
  0xef   :  { %1092 = vmatprep.subr.mxu0 %v1132_v0  ;;  %1094 = vmatprep.mubr.msk.f32.mxu0 %vm1133_vm2, %v1132_v0 }
  0xf0   :  { %1093 = vmatpush3.msra.mxu0 %v1239_v32  ;;  %1126 = vmatpush3.msra.mxu1 %v1230_v28 }
  0xf1   :  { %1127 = vmatprep.mubr.msk.f32.mxu1 %vm1133_vm2, %v1132_v0  ;;  %1095 = vmatmul.mubr.f32.vlgmr.msra.gmra.mxu0 %v569_v61 }
  0xf2   :  { %1108 = vmatprep.subr.mxu0 %v1132_v0  ;;  %1128 = vmatmul.mubr.f32.vlgmr.msra.gmra.mxu1 %v568_v60 }
  0xf3   :  { %1109 = vmatpush3.msra.mxu0 %v605_v21  ;;  %1116 = vmatprep.mubr.msk.f32.mxu0 %vm1133_vm2, %v1132_v0 }
  0xf4   :  { %1110 = vmatprep.subr.mxu0 %v1132_v0 }
  0xf5   :  { %1111 = vmatpush3.msra.mxu0 %v612_v26 }
  0xf6   :  { %1112 = vmatprep.subr.mxu0 %v1132_v0 }
  0xf7   :  { %1113 = vmatpush3.msra.mxu0 %v619_v31 }
  0xf8   :  { %1114 = vmatprep.subr.mxu0 %v1132_v0 }
  0xf9   :  { %1115 = vmatpush3.msra.mxu0 %v626_v35 }
  0xfa   :  { %1117 = vmatmul.mubr.f32.vlgmr.msra.gmra.mxu0 %v568_v60 }
 0x1a0   :  { %v665_v2 = vpop.f32.mrf.mxu1 }
 0x1a2   :  { %v1085_v3 = vpop.f32.mrf.mxu1 }
 0x1a8   :  { %v822_v4 = vpop.f32.mrf.mxu1 }
 0x1a9   :  { %v574_v5 = vpop.f32.mrf.mxu0 }
 0x1aa   :  { %v1107_v6 = vpop.f32.mrf.mxu1  ;;  %v575_v9 = vadd.f32 %v991_v8, %v574_v5 }
 0x1ab   :  { %v1074_v7 = vpop.f32.mrf.mxu0 }
 0x1ac   :  { %v666_v12 = vadd.f32 %v665_v2, %v575_v9 }
 0x1b1   :  { %v745_v10 = vpop.f32.mrf.mxu0 }
 0x1b2   :  { %v980_v11 = vpop.f32.mrf.mxu1  ;;  %v746_v14 = vadd.f32 %v745_v10, %v666_v12 }
 0x1b3   :  { %v1096_v13 = vpop.f32.mrf.mxu0 }
 0x1b4   :  { %v1129_v0 = vpop.f32.mrf.mxu1  ;;  %v823_v15 = vadd.f32 %v822_v4, %v746_v14 }
 0x1ba   :  { %v905_v16 = vpop.f32.mrf.mxu0 }
 0x1bb   :  { %v906_v17 = vadd.f32 %v905_v16, %v823_v15 }
 0x1bc   :  { %v1118_v18 = vpop.f32.mrf.mxu0 }
 0x1bd   :  { %v981_v19 = vadd.f32 %v980_v11, %v906_v17 }
 0x1bf   :  { %985 = vst.msk [vmem:[%s1310_s5] sm:$0xff] %vm984_vm4, %v981_v19 }

</bundles_post_ra>
